<compile_context>
chip_gen: v6e
topology: v6e:2x2x1
jax: 0.10.0
libtpu: 0.0.40
codegen_flags: <defaults>
</compile_context>

<pallas_src>
import math

import jax
import jax.numpy as jnp
from jax.experimental import pallas as pl
from jax.experimental.pallas import tpu as pltpu

# ~1 MiB per tile: with double-buffered input + output that is ~4 MiB live,
# safely under the scoped VMEM default on every generation (16/32/32 MiB).
_TARGET_TILE_BYTES = 1 << 20
# Below this the per-launch / per-grid-step overhead dwarfs the copy; the
# squeeze is metadata-only so a pure reshape is strictly better.
_MIN_KERNEL_ELEMS = 1 << 16


def _copy_kernel(x_ref, o_ref):
    # Whole-tile identity copy: full-width loads/stores, nothing else.
    o_ref[...] = x_ref[...]


def _pallas_identity_copy_2d(x2d):
    """Row-tiled, pipelined VMEM copy of a lane-dense 2-D array."""
    rows, cols = x2d.shape
    itemsize = jnp.dtype(x2d.dtype).itemsize

    # Tile rows so each block is ~_TARGET_TILE_BYTES; keep it a multiple of 8
    # (sublane constraint) unless it covers the full row extent.
    tile_r = max(8, (_TARGET_TILE_BYTES // (cols * itemsize)) // 8 * 8)
    if tile_r >= rows:
        tile_r = rows  # full extent -> no divisibility constraint

    grid = (pl.cdiv(rows, tile_r),)
    return pl.pallas_call(
        _copy_kernel,
        out_shape=jax.ShapeDtypeStruct((rows, cols), x2d.dtype),
        grid=grid,
        in_specs=[pl.BlockSpec((tile_r, cols), lambda i: (i, 0))],
        out_specs=pl.BlockSpec((tile_r, cols), lambda i: (i, 0)),
        compiler_params=pltpu.CompilerParams(
            dimension_semantics=("parallel",)),
    )(x2d)


def fourth_dim_squeeze(x):
    """JAX/Pallas equivalent of FourthDimSqueeze.forward."""
    if x.ndim == 4 and x.shape[2] == 1:
        # torch .squeeze(): remove ALL size-1 dimensions.
        out_shape = tuple(d for d in x.shape if d != 1)
    else:
        out_shape = x.shape

    total = int(math.prod(x.shape)) if x.ndim > 0 else 1

    # Squeeze is metadata-only: for tiny, empty, or non-lane-dense inputs skip
    # the HBM round trip entirely.
    if total < _MIN_KERNEL_ELEMS or total % 128 != 0:
        return x.reshape(out_shape)

    # Lane-dense 2-D view: pick the widest col count (multiple of 128) that
    # divides the total element count so stores stay unmasked and full-width.
    cols = 128
    for c in (1024, 512, 256, 128):
        if total % c == 0:
            cols = c
            break

    x2d = x.reshape(-1, cols)
    y2d = _pallas_identity_copy_2d(x2d)
    return y2d.reshape(out_shape)


if __name__ == "__main__":
    key = jax.random.PRNGKey(0)
    k1, k2, k3, k4 = jax.random.split(key, 4)

    # Case 1: 4-D with dim2 == 1  ->  squeezed output (2, 4, 16)  [reshape fast path]
    x1 = jax.random.normal(k1, (2, 4, 1, 16), dtype=jnp.float32)
    y1 = jax.block_until_ready(fourth_dim_squeeze(x1))
    assert y1.shape == (2, 4, 16)
    assert jnp.array_equal(y1, jnp.squeeze(x1, axis=2))

    # Case 2: 4-D with dim2 != 1  ->  passthrough (2, 4, 16, 16)  [reshape fast path]
    x2 = jax.random.normal(k2, (2, 4, 16, 16), dtype=jnp.float32)
    y2 = jax.block_until_ready(fourth_dim_squeeze(x2))
    assert y2.shape == x2.shape
    assert jnp.array_equal(y2, x2)

    # Case 3: dim2 == 1 AND a leading size-1 dim -> both squeezed (4, 16)
    x3 = jax.random.normal(k3, (1, 4, 1, 16), dtype=jnp.float32)
    y3 = jax.block_until_ready(fourth_dim_squeeze(x3))
    assert y3.shape == (4, 16)
    assert jnp.array_equal(y3, x3.reshape(4, 16))

    # Case 4: larger squeeze case — exercises the Pallas kernel with lane-dense
    # cols=1024 and a multi-block (2-step) parallel row grid.
    x4 = jax.random.normal(k4, (16, 64, 1, 512), dtype=jnp.float32)
    y4 = jax.block_until_ready(fourth_dim_squeeze(x4))
    assert y4.shape == (16, 64, 512)
    assert jnp.array_equal(y4, jnp.squeeze(x4, axis=2))

    print("KERNEL_OK")
</pallas_src>

<mosaic_0001>
module attributes {stable_mosaic.version = 11 : i64} {
  func.func @_copy_kernel(%arg0: i32, %arg1: memref<256x1024xf32, #tpu.memory_space<vmem>>, %arg2: memref<256x1024xf32, #tpu.memory_space<vmem>>) attributes {dimension_semantics = [#tpu.dimension_semantics<parallel>], iteration_bounds = array<i64: 2>, scalar_prefetch = 0 : i64, scratch_operands = 0 : i64, tpu.core_type = #tpu.core_type<tc>, window_params = [{transform_indices = @transform_0, window_bounds = array<i64: 256, 1024>}, {transform_indices = @transform_1, window_bounds = array<i64: 256, 1024>}]} {
    %c0 = arith.constant 0 : index
    %c0_0 = arith.constant 0 : index
    %0 = vector.load %arg1[%c0, %c0_0] : memref<256x1024xf32, #tpu.memory_space<vmem>>, vector<256x1024xf32>
    %c0_1 = arith.constant 0 : index
    %c0_2 = arith.constant 0 : index
    %1 = vector.load %arg2[%c0_1, %c0_2] : memref<256x1024xf32, #tpu.memory_space<vmem>>, vector<256x1024xf32>
    tpu.vector_store %arg2[%c0_1, %c0_2], %0 {strides = array<i32>} : memref<256x1024xf32, #tpu.memory_space<vmem>>, vector<256x1024xf32>,
    return
  }
  func.func @transform_0(%arg0: i32) -> (i32, i32) {
    %c0_i32 = arith.constant 0 : i32
    %c0_i32_0 = arith.constant 0 : i32
    return %arg0, %c0_i32 : i32, i32
  }
  func.func @transform_1(%arg0: i32) -> (i32, i32) {
    %c0_i32 = arith.constant 0 : i32
    %c0_i32_0 = arith.constant 0 : i32
    return %arg0, %c0_i32 : i32, i32
  }
}

</mosaic_0001>

<bundles_post_ra>
// kernel: tpu_custom_call.1
= control target key start
LH: loop header
LB: loop body
LE: loop exit
PB: predicated region body
PF: predicated region fallthrough
CT: control target
= control target key end

     0   :  { %6 = vsyncpa [#allocation3], 0  ;;  %s1589_s0 = inlined_call_operand.hbm [shape: f32[512,1024], index: 0, kind: input, shape index: {}]   ;;  %s1590_s1 = inlined_call_operand.hbm [shape: f32[512,1024], index: 1, kind: output, shape index: {}]  }
   0x1   :  { %8 = vsyncpa [#allocation3 + $0x1], 0 }
   0x2   :  { %9 = vsyncpa [#allocation4], 0 }
   0x3   :  { %11 = vsyncpa [#allocation4 + $0x1], 0  ;;  %s918_s6 = smov 0   ;;  %s920_s7 = smov 0  }
   0x4   :  { %s922_s8 = smov 0   ;;  %s924_s9 = smov 0  }
   0x5 LB: > { %s939_s10 = sadd.s32 4294967295, %s900_s9   ;;  %s738_s11 = sadd.s32 4294967294, %s900_s9   ;;  %s900_s9 = sphi %s924_s9, %s1605_s9   ;;  %s896_s8 = sphi %s922_s8, %s1604_s8   ;;  %s892_s7 = sphi %s920_s7, %s1603_s7   ;;  %s888_s6 = sphi %s918_s6, %s1602_s6  }
   0x6   : > { %s943_s12 = sadd.s32 1, %s900_s9   ;;  %s24_s13 = sadd.s32 1, %s896_s8 }
   0x7   : > { %s21_s14 = ssub.s32 %s900_s9, %s943_s12  ;;  %p31_p0 = scmp.ne.s32.totalorder %s896_s8, %s892_s7 }
   0x8   : > { %p22_p1 = scmp.eq.s32.totalorder %s21_s14, 0  ;;  %p32_p2 = scmp.eq.s32.totalorder %s900_s9, 0 }
   0x9   : > { %p37_p3 = scmp.ne.s32.totalorder %s892_s7, %s888_s6  ;;  %p38_p4 = scmp.eq.s32.totalorder %s939_s10, 0 }
   0xa   : > { %s955_s15 = scalar_select %p22_p1, %s896_s8, %s24_s13  }
   0xb   : > { %p957_p5 = por %p32_p2, %p31_p0  ;;  %p961_p6 = por %p38_p4, %p37_p3 }
   0xc   : > { %p61_p7 = scmp.eq.s32.totalorder %s939_s10, 1  ;;  %p67_p8 = scmp.eq.s32.totalorder %s738_s11, 1 }
   0xd   : > { %s1594_s17 = scalar_select %p961_p6, 1, 0 }
   0xe   : > { %p770_p10 = scmp.lt.s32.totalorder %s900_s9, 2  ;;  %p968_p11 = por %p61_p7, %p31_p0 }
   0xf   : > { %p972_p12 = por %p67_p8, %p37_p3  ;;  %s87_s20 = sand.u32 1, %s896_s8  }
  0x10   : > { %s1595_s18 = scalar_select %p968_p11, 1, 0 }
  0x11   : > { %s1596_s19 = scalar_select %p972_p12, 1, 0 }
  0x12   : > { %s755_s21 = sshll.u32 %s900_s9, 15  ;;  %s741_s22 = sshll.u32 %s87_s20, 11 }
  0x13   : > { %s981_s25 = scalar_lea.hbm %s1589_s0, %s755_s21  ;;  %s91_s26 = scalar_lea.vmem [#allocation2], %s741_s22 }
  0x14   : > { %s99_s27 = sshll.u32 %s91_s26, 4  ;;  %p985_p13 = pnand %p770_p10, %p957_p5  ;;  %s989_s27 = int_to_ptr.vmem [resolvable:$true] %s99_s27 }
  0x15   : > { %s991_s29 = scalar_lea.sflag [#allocation3], %s87_s20  ;;  %s808_s30 = scalar_lea.hbm %s981_s25, 32768 }
  0x16   : > { %p809_p0 = scmp.ne.s32.totalorder %s981_s25, %s808_s30  ;;  %p810_p1 = pneg %p985_p13 }
  0x17   : > { %s813_s4 = scalar_lea.hbm %s1589_s0, 65536  ;;  %p814_p4 = scmp.lt.s32.totalorder %s981_s25, %s1589_s0 }
  0x18   : > { %p811_p2 = pnand %p810_p1, %p809_p0  ;;  %p815_p5 = scmp.lt.s32.totalorder %s813_s4, %s808_s30 }
  0x1a   : > { %p812_p3 = pneg %p811_p2  ;;  %p816_p7 = por %p815_p5, %p814_p4 }
  0x1c   : > { %p817_p8 = pnand %p816_p7, %p812_p3 }
  0x1e   : > { %820 = shalt.err (!%p817_p8)
}
  0x1f   : > { %s821_s13 = scalar_lea.vmem %s989_s27, 32768  ;;  %s902_s14 = smov [#allocation2]  }
  0x20   : > { %p822_p10 = scmp.ne.s32.totalorder %s989_s27, %s821_s13  ;;  %s826_s16 = sshll.u32 %s902_s14, 4  ;;  %s827_s16 = int_to_ptr.vmem [resolvable:$false] %s826_s16 }
  0x21   : > { %s828_s20 = scalar_lea.vmem %s827_s16, 65536  ;;  %p829_p2 = scmp.lt.s32.totalorder %s989_s27, %s827_s16 }
  0x22   : > { %p824_p9 = pnand %p822_p10, %p810_p1  ;;  %p830_p12 = scmp.lt.s32.totalorder %s828_s20, %s821_s13 }
  0x24   : > { %p825_p0 = pneg %p824_p9  ;;  %p831_p11 = por %p830_p12, %p829_p2 }
  0x26   : > { %p832_p6 = pnand %p831_p11, %p825_p0 }
  0x28   : > { %835 = shalt.err (!%p832_p6)
}
  0x29   : > { %s903_s21 = smov 1024   ;;  %s904_s22 = smov 64  }
  0x2a   : > { %765 = dma.hbm_to_vmem [thread:$0]  (!%p985_p13), %s981_s25, 32768, %s989_s27, %s991_s29, %s903_s21, %s903_s21, %s904_s22  }
  0x2b   : > { %p745_p9 = scmp.ge.s32.totalorder %s900_s9, 1  ;;  %p107_p1 = scmp.lt.s32.totalorder %s900_s9, 3 }
  0x2d   : > { %p108_p3 = pnand %p745_p9, %p107_p1 }
  0x2e   : > { %s1015_s23 = sand.u32 (!%p108_p3), 1, %s892_s7   ;;  %p1598_p6 = scmp.ne.s32.totalorder (!%p108_p3), %s1594_s17, 0 }
  0x2f   : > { %111 = sbr.rel (%p108_p3) target bundleno = 195 (0xc3), region = 24  ;;  %s746_s24 = sshll.u32 (!%p108_p3), %s1015_s23, 11 }
  0x30   : > { %s114_s26 = scalar_lea.sflag (!%p108_p3), [#allocation3], %s1015_s23  ;;  %s1019_s30 = scalar_lea.vmem (!%p108_p3), [#allocation2], %s746_s24 }
  0x34   : > { %879 = dma.done.wait (%p1598_p6), %s114_s26, 32768  }
  0x35   : > { %881 = vsyncadd (%p1598_p6), %s114_s26, 4294934528  ;;  %v138_v0 = vld [vmem:[%s1019_s30] sm:$0xff]  ;;  %v139_v1 = vld [vmem:[%s1019_s30 + $0x8] sm:$0xff]  ;;  %s1028_s25 = scalar_lea.vmem [#allocation5], %s746_s24  ;;  %s757_s17 = sshll.u32 %s939_s10, 15 }
  0x36   : > { %v140_v2 = vld [vmem:[%s1019_s30 + $0x10] sm:$0xff]  ;;  %394 = vst [vmem:[%s1028_s25] sm:$0xff] %v138_v0  ;;  %395 = vst [vmem:[%s1028_s25 + $0x8] sm:$0xff] %v139_v1  ;;  %v141_v3 = vld [vmem:[%s1019_s30 + $0x18] sm:$0xff]  ;;  %s665_s27 = sshll.u32 %s1028_s25, 4  ;;  %s1533_s29 = scalar_lea.hbm %s1590_s1, %s757_s17  ;;  %s1535_s27 = int_to_ptr.vmem [resolvable:$true] %s665_s27 }
  0x37   : > { %396 = vst [vmem:[%s1028_s25 + $0x10] sm:$0xff] %v140_v2  ;;  %v142_v4 = vld [vmem:[%s1019_s30 + $0x20] sm:$0xff]  ;;  %v143_v5 = vld [vmem:[%s1019_s30 + $0x28] sm:$0xff]  ;;  %397 = vst [vmem:[%s1028_s25 + $0x18] sm:$0xff] %v141_v3  ;;  %s651_s2 = scalar_lea.sflag [#allocation4], %s1015_s23  ;;  %s836_s3 = scalar_lea.vmem %s1535_s27, 32768 }
  0x38   : > { %398 = vst [vmem:[%s1028_s25 + $0x20] sm:$0xff] %v142_v4  ;;  %399 = vst [vmem:[%s1028_s25 + $0x28] sm:$0xff] %v143_v5  ;;  %v144_v6 = vld [vmem:[%s1019_s30 + $0x30] sm:$0xff]  ;;  %v145_v7 = vld [vmem:[%s1019_s30 + $0x38] sm:$0xff]  ;;  %p837_p11 = scmp.ne.s32.totalorder %s1535_s27, %s836_s3  ;;  %p1599_p12 = scmp.ne.s32.totalorder %s1595_s18, 0 }
  0x39   : > { %v146_v8 = vld [vmem:[%s1019_s30 + $0x40] sm:$0xff]  ;;  %400 = vst [vmem:[%s1028_s25 + $0x30] sm:$0xff] %v144_v6  ;;  %401 = vst [vmem:[%s1028_s25 + $0x38] sm:$0xff] %v145_v7  ;;  %v147_v9 = vld [vmem:[%s1019_s30 + $0x48] sm:$0xff]  ;;  %s905_s4 = smov [#allocation5]  }
  0x3a   : > { %402 = vst [vmem:[%s1028_s25 + $0x40] sm:$0xff] %v146_v8  ;;  %v148_v10 = vld [vmem:[%s1019_s30 + $0x50] sm:$0xff]  ;;  %v149_v11 = vld [vmem:[%s1019_s30 + $0x58] sm:$0xff]  ;;  %403 = vst [vmem:[%s1028_s25 + $0x48] sm:$0xff] %v147_v9  ;;  %p838_p13 = pnand %p837_p11, %p1599_p12  ;;  %s840_s5 = sshll.u32 %s905_s4, 4  ;;  %s841_s5 = int_to_ptr.vmem [resolvable:$false] %s840_s5 }
  0x3b   : > { %404 = vst [vmem:[%s1028_s25 + $0x50] sm:$0xff] %v148_v10  ;;  %405 = vst [vmem:[%s1028_s25 + $0x58] sm:$0xff] %v149_v11  ;;  %v150_v12 = vld [vmem:[%s1019_s30 + $0x60] sm:$0xff]  ;;  %v151_v13 = vld [vmem:[%s1019_s30 + $0x68] sm:$0xff]  ;;  %s842_s11 = scalar_lea.vmem %s841_s5, 65536  ;;  %p843_p5 = scmp.lt.s32.totalorder %s1535_s27, %s841_s5 }
  0x3c   : > { %v152_v14 = vld [vmem:[%s1019_s30 + $0x70] sm:$0xff]  ;;  %406 = vst [vmem:[%s1028_s25 + $0x60] sm:$0xff] %v150_v12  ;;  %407 = vst [vmem:[%s1028_s25 + $0x68] sm:$0xff] %v151_v13  ;;  %v153_v15 = vld [vmem:[%s1019_s30 + $0x78] sm:$0xff]  ;;  %p839_p4 = pneg %p838_p13  ;;  %p844_p7 = scmp.lt.s32.totalorder %s842_s11, %s836_s3 }
  0x3d   : > { %408 = vst [vmem:[%s1028_s25 + $0x70] sm:$0xff] %v152_v14  ;;  %v154_v16 = vld [vmem:[%s1019_s30 + $0x80] sm:$0xff]  ;;  %v155_v17 = vld [vmem:[%s1019_s30 + $0x88] sm:$0xff]  ;;  %409 = vst [vmem:[%s1028_s25 + $0x78] sm:$0xff] %v153_v15 }
  0x3e   : > { %410 = vst [vmem:[%s1028_s25 + $0x80] sm:$0xff] %v154_v16  ;;  %411 = vst [vmem:[%s1028_s25 + $0x88] sm:$0xff] %v155_v17  ;;  %v156_v18 = vld [vmem:[%s1019_s30 + $0x90] sm:$0xff]  ;;  %v157_v19 = vld [vmem:[%s1019_s30 + $0x98] sm:$0xff]  ;;  %p845_p8 = por %p844_p7, %p843_p5 }
  0x3f   : > { %v158_v20 = vld [vmem:[%s1019_s30 + $0xa0] sm:$0xff]  ;;  %412 = vst [vmem:[%s1028_s25 + $0x90] sm:$0xff] %v156_v18  ;;  %413 = vst [vmem:[%s1028_s25 + $0x98] sm:$0xff] %v157_v19  ;;  %v159_v21 = vld [vmem:[%s1019_s30 + $0xa8] sm:$0xff] }
  0x40   : > { %414 = vst [vmem:[%s1028_s25 + $0xa0] sm:$0xff] %v158_v20  ;;  %v160_v22 = vld [vmem:[%s1019_s30 + $0xb0] sm:$0xff]  ;;  %v161_v23 = vld [vmem:[%s1019_s30 + $0xb8] sm:$0xff]  ;;  %415 = vst [vmem:[%s1028_s25 + $0xa8] sm:$0xff] %v159_v21  ;;  %p846_p10 = pnand %p845_p8, %p839_p4 }
  0x41   : > { %416 = vst [vmem:[%s1028_s25 + $0xb0] sm:$0xff] %v160_v22  ;;  %417 = vst [vmem:[%s1028_s25 + $0xb8] sm:$0xff] %v161_v23  ;;  %v162_v24 = vld [vmem:[%s1019_s30 + $0xc0] sm:$0xff]  ;;  %v163_v25 = vld [vmem:[%s1019_s30 + $0xc8] sm:$0xff] }
  0x42   : > { %v164_v26 = vld [vmem:[%s1019_s30 + $0xd0] sm:$0xff]  ;;  %418 = vst [vmem:[%s1028_s25 + $0xc0] sm:$0xff] %v162_v24  ;;  %419 = vst [vmem:[%s1028_s25 + $0xc8] sm:$0xff] %v163_v25  ;;  %v165_v27 = vld [vmem:[%s1019_s30 + $0xd8] sm:$0xff] }
  0x43   : > { %420 = vst [vmem:[%s1028_s25 + $0xd0] sm:$0xff] %v164_v26  ;;  %v166_v28 = vld [vmem:[%s1019_s30 + $0xe0] sm:$0xff]  ;;  %v167_v29 = vld [vmem:[%s1019_s30 + $0xe8] sm:$0xff]  ;;  %421 = vst [vmem:[%s1028_s25 + $0xd8] sm:$0xff] %v165_v27 }
  0x44   : > { %422 = vst [vmem:[%s1028_s25 + $0xe0] sm:$0xff] %v166_v28  ;;  %423 = vst [vmem:[%s1028_s25 + $0xe8] sm:$0xff] %v167_v29  ;;  %v168_v30 = vld [vmem:[%s1019_s30 + $0xf0] sm:$0xff]  ;;  %v169_v31 = vld [vmem:[%s1019_s30 + $0xf8] sm:$0xff] }
  0x45   : > { %v170_v32 = vld [vmem:[%s1019_s30 + $0x100] sm:$0xff]  ;;  %424 = vst [vmem:[%s1028_s25 + $0xf0] sm:$0xff] %v168_v30  ;;  %425 = vst [vmem:[%s1028_s25 + $0xf8] sm:$0xff] %v169_v31  ;;  %v171_v33 = vld [vmem:[%s1019_s30 + $0x108] sm:$0xff] }
  0x46   : > { %426 = vst [vmem:[%s1028_s25 + $0x100] sm:$0xff] %v170_v32  ;;  %v172_v34 = vld [vmem:[%s1019_s30 + $0x110] sm:$0xff]  ;;  %v173_v35 = vld [vmem:[%s1019_s30 + $0x118] sm:$0xff]  ;;  %427 = vst [vmem:[%s1028_s25 + $0x108] sm:$0xff] %v171_v33 }
  0x47   : > { %428 = vst [vmem:[%s1028_s25 + $0x110] sm:$0xff] %v172_v34  ;;  %429 = vst [vmem:[%s1028_s25 + $0x118] sm:$0xff] %v173_v35  ;;  %v174_v36 = vld [vmem:[%s1019_s30 + $0x120] sm:$0xff]  ;;  %v175_v37 = vld [vmem:[%s1019_s30 + $0x128] sm:$0xff] }
  0x48   : > { %v176_v38 = vld [vmem:[%s1019_s30 + $0x130] sm:$0xff]  ;;  %430 = vst [vmem:[%s1028_s25 + $0x120] sm:$0xff] %v174_v36  ;;  %431 = vst [vmem:[%s1028_s25 + $0x128] sm:$0xff] %v175_v37  ;;  %v177_v39 = vld [vmem:[%s1019_s30 + $0x138] sm:$0xff] }
  0x49   : > { %432 = vst [vmem:[%s1028_s25 + $0x130] sm:$0xff] %v176_v38  ;;  %v178_v40 = vld [vmem:[%s1019_s30 + $0x140] sm:$0xff]  ;;  %v179_v41 = vld [vmem:[%s1019_s30 + $0x148] sm:$0xff]  ;;  %433 = vst [vmem:[%s1028_s25 + $0x138] sm:$0xff] %v177_v39 }
  0x4a   : > { %434 = vst [vmem:[%s1028_s25 + $0x140] sm:$0xff] %v178_v40  ;;  %435 = vst [vmem:[%s1028_s25 + $0x148] sm:$0xff] %v179_v41  ;;  %v180_v42 = vld [vmem:[%s1019_s30 + $0x150] sm:$0xff]  ;;  %v181_v43 = vld [vmem:[%s1019_s30 + $0x158] sm:$0xff] }
  0x4b   : > { %v182_v44 = vld [vmem:[%s1019_s30 + $0x160] sm:$0xff]  ;;  %436 = vst [vmem:[%s1028_s25 + $0x150] sm:$0xff] %v180_v42  ;;  %437 = vst [vmem:[%s1028_s25 + $0x158] sm:$0xff] %v181_v43  ;;  %v183_v45 = vld [vmem:[%s1019_s30 + $0x168] sm:$0xff] }
  0x4c   : > { %438 = vst [vmem:[%s1028_s25 + $0x160] sm:$0xff] %v182_v44  ;;  %v184_v46 = vld [vmem:[%s1019_s30 + $0x170] sm:$0xff]  ;;  %v185_v47 = vld [vmem:[%s1019_s30 + $0x178] sm:$0xff]  ;;  %439 = vst [vmem:[%s1028_s25 + $0x168] sm:$0xff] %v183_v45 }
  0x4d   : > { %440 = vst [vmem:[%s1028_s25 + $0x170] sm:$0xff] %v184_v46  ;;  %441 = vst [vmem:[%s1028_s25 + $0x178] sm:$0xff] %v185_v47  ;;  %v186_v48 = vld [vmem:[%s1019_s30 + $0x180] sm:$0xff]  ;;  %v187_v49 = vld [vmem:[%s1019_s30 + $0x188] sm:$0xff] }
  0x4e   : > { %v188_v50 = vld [vmem:[%s1019_s30 + $0x190] sm:$0xff]  ;;  %442 = vst [vmem:[%s1028_s25 + $0x180] sm:$0xff] %v186_v48  ;;  %443 = vst [vmem:[%s1028_s25 + $0x188] sm:$0xff] %v187_v49  ;;  %v189_v51 = vld [vmem:[%s1019_s30 + $0x198] sm:$0xff] }
  0x4f   : > { %444 = vst [vmem:[%s1028_s25 + $0x190] sm:$0xff] %v188_v50  ;;  %v190_v52 = vld [vmem:[%s1019_s30 + $0x1a0] sm:$0xff]  ;;  %v191_v53 = vld [vmem:[%s1019_s30 + $0x1a8] sm:$0xff]  ;;  %445 = vst [vmem:[%s1028_s25 + $0x198] sm:$0xff] %v189_v51 }
  0x50   : > { %446 = vst [vmem:[%s1028_s25 + $0x1a0] sm:$0xff] %v190_v52  ;;  %447 = vst [vmem:[%s1028_s25 + $0x1a8] sm:$0xff] %v191_v53  ;;  %v192_v54 = vld [vmem:[%s1019_s30 + $0x1b0] sm:$0xff]  ;;  %v193_v55 = vld [vmem:[%s1019_s30 + $0x1b8] sm:$0xff] }
  0x51   : > { %v194_v56 = vld [vmem:[%s1019_s30 + $0x1c0] sm:$0xff]  ;;  %448 = vst [vmem:[%s1028_s25 + $0x1b0] sm:$0xff] %v192_v54  ;;  %449 = vst [vmem:[%s1028_s25 + $0x1b8] sm:$0xff] %v193_v55  ;;  %v195_v57 = vld [vmem:[%s1019_s30 + $0x1c8] sm:$0xff] }
  0x52   : > { %450 = vst [vmem:[%s1028_s25 + $0x1c0] sm:$0xff] %v194_v56  ;;  %v196_v58 = vld [vmem:[%s1019_s30 + $0x1d0] sm:$0xff]  ;;  %v197_v59 = vld [vmem:[%s1019_s30 + $0x1d8] sm:$0xff]  ;;  %451 = vst [vmem:[%s1028_s25 + $0x1c8] sm:$0xff] %v195_v57 }
  0x53   : > { %452 = vst [vmem:[%s1028_s25 + $0x1d0] sm:$0xff] %v196_v58  ;;  %453 = vst [vmem:[%s1028_s25 + $0x1d8] sm:$0xff] %v197_v59  ;;  %v198_v60 = vld [vmem:[%s1019_s30 + $0x1e0] sm:$0xff]  ;;  %v199_v61 = vld [vmem:[%s1019_s30 + $0x1e8] sm:$0xff] }
  0x54   : > { %v200_v62 = vld [vmem:[%s1019_s30 + $0x1f0] sm:$0xff]  ;;  %454 = vst [vmem:[%s1028_s25 + $0x1e0] sm:$0xff] %v198_v60  ;;  %455 = vst [vmem:[%s1028_s25 + $0x1e8] sm:$0xff] %v199_v61  ;;  %v201_v63 = vld [vmem:[%s1019_s30 + $0x1f8] sm:$0xff] }
  0x55   : > { %456 = vst [vmem:[%s1028_s25 + $0x1f0] sm:$0xff] %v200_v62  ;;  %v202_v0 = vld [vmem:[%s1019_s30 + $0x200] sm:$0xff]  ;;  %v203_v1 = vld [vmem:[%s1019_s30 + $0x208] sm:$0xff]  ;;  %457 = vst [vmem:[%s1028_s25 + $0x1f8] sm:$0xff] %v201_v63 }
  0x56   : > { %458 = vst [vmem:[%s1028_s25 + $0x200] sm:$0xff] %v202_v0  ;;  %459 = vst [vmem:[%s1028_s25 + $0x208] sm:$0xff] %v203_v1  ;;  %v204_v2 = vld [vmem:[%s1019_s30 + $0x210] sm:$0xff]  ;;  %v205_v3 = vld [vmem:[%s1019_s30 + $0x218] sm:$0xff] }
  0x57   : > { %v206_v4 = vld [vmem:[%s1019_s30 + $0x220] sm:$0xff]  ;;  %460 = vst [vmem:[%s1028_s25 + $0x210] sm:$0xff] %v204_v2  ;;  %461 = vst [vmem:[%s1028_s25 + $0x218] sm:$0xff] %v205_v3  ;;  %v207_v5 = vld [vmem:[%s1019_s30 + $0x228] sm:$0xff] }
  0x58   : > { %462 = vst [vmem:[%s1028_s25 + $0x220] sm:$0xff] %v206_v4  ;;  %v208_v6 = vld [vmem:[%s1019_s30 + $0x230] sm:$0xff]  ;;  %v209_v7 = vld [vmem:[%s1019_s30 + $0x238] sm:$0xff]  ;;  %463 = vst [vmem:[%s1028_s25 + $0x228] sm:$0xff] %v207_v5 }
  0x59   : > { %464 = vst [vmem:[%s1028_s25 + $0x230] sm:$0xff] %v208_v6  ;;  %465 = vst [vmem:[%s1028_s25 + $0x238] sm:$0xff] %v209_v7  ;;  %v210_v8 = vld [vmem:[%s1019_s30 + $0x240] sm:$0xff]  ;;  %v211_v9 = vld [vmem:[%s1019_s30 + $0x248] sm:$0xff] }
  0x5a   : > { %v212_v10 = vld [vmem:[%s1019_s30 + $0x250] sm:$0xff]  ;;  %466 = vst [vmem:[%s1028_s25 + $0x240] sm:$0xff] %v210_v8  ;;  %467 = vst [vmem:[%s1028_s25 + $0x248] sm:$0xff] %v211_v9  ;;  %v213_v11 = vld [vmem:[%s1019_s30 + $0x258] sm:$0xff] }
  0x5b   : > { %468 = vst [vmem:[%s1028_s25 + $0x250] sm:$0xff] %v212_v10  ;;  %v214_v12 = vld [vmem:[%s1019_s30 + $0x260] sm:$0xff]  ;;  %v215_v13 = vld [vmem:[%s1019_s30 + $0x268] sm:$0xff]  ;;  %469 = vst [vmem:[%s1028_s25 + $0x258] sm:$0xff] %v213_v11 }
  0x5c   : > { %470 = vst [vmem:[%s1028_s25 + $0x260] sm:$0xff] %v214_v12  ;;  %471 = vst [vmem:[%s1028_s25 + $0x268] sm:$0xff] %v215_v13  ;;  %v216_v14 = vld [vmem:[%s1019_s30 + $0x270] sm:$0xff]  ;;  %v217_v15 = vld [vmem:[%s1019_s30 + $0x278] sm:$0xff] }
  0x5d   : > { %v218_v16 = vld [vmem:[%s1019_s30 + $0x280] sm:$0xff]  ;;  %472 = vst [vmem:[%s1028_s25 + $0x270] sm:$0xff] %v216_v14  ;;  %473 = vst [vmem:[%s1028_s25 + $0x278] sm:$0xff] %v217_v15  ;;  %v219_v17 = vld [vmem:[%s1019_s30 + $0x288] sm:$0xff] }
  0x5e   : > { %474 = vst [vmem:[%s1028_s25 + $0x280] sm:$0xff] %v218_v16  ;;  %v220_v18 = vld [vmem:[%s1019_s30 + $0x290] sm:$0xff]  ;;  %v221_v19 = vld [vmem:[%s1019_s30 + $0x298] sm:$0xff]  ;;  %475 = vst [vmem:[%s1028_s25 + $0x288] sm:$0xff] %v219_v17 }
  0x5f   : > { %476 = vst [vmem:[%s1028_s25 + $0x290] sm:$0xff] %v220_v18  ;;  %477 = vst [vmem:[%s1028_s25 + $0x298] sm:$0xff] %v221_v19  ;;  %v222_v20 = vld [vmem:[%s1019_s30 + $0x2a0] sm:$0xff]  ;;  %v223_v21 = vld [vmem:[%s1019_s30 + $0x2a8] sm:$0xff] }
  0x60   : > { %v224_v22 = vld [vmem:[%s1019_s30 + $0x2b0] sm:$0xff]  ;;  %478 = vst [vmem:[%s1028_s25 + $0x2a0] sm:$0xff] %v222_v20  ;;  %479 = vst [vmem:[%s1028_s25 + $0x2a8] sm:$0xff] %v223_v21  ;;  %v225_v23 = vld [vmem:[%s1019_s30 + $0x2b8] sm:$0xff] }
  0x61   : > { %480 = vst [vmem:[%s1028_s25 + $0x2b0] sm:$0xff] %v224_v22  ;;  %v226_v24 = vld [vmem:[%s1019_s30 + $0x2c0] sm:$0xff]  ;;  %v227_v25 = vld [vmem:[%s1019_s30 + $0x2c8] sm:$0xff]  ;;  %481 = vst [vmem:[%s1028_s25 + $0x2b8] sm:$0xff] %v225_v23 }
  0x62   : > { %482 = vst [vmem:[%s1028_s25 + $0x2c0] sm:$0xff] %v226_v24  ;;  %483 = vst [vmem:[%s1028_s25 + $0x2c8] sm:$0xff] %v227_v25  ;;  %v228_v26 = vld [vmem:[%s1019_s30 + $0x2d0] sm:$0xff]  ;;  %v229_v27 = vld [vmem:[%s1019_s30 + $0x2d8] sm:$0xff] }
  0x63   : > { %v230_v28 = vld [vmem:[%s1019_s30 + $0x2e0] sm:$0xff]  ;;  %484 = vst [vmem:[%s1028_s25 + $0x2d0] sm:$0xff] %v228_v26  ;;  %485 = vst [vmem:[%s1028_s25 + $0x2d8] sm:$0xff] %v229_v27  ;;  %v231_v29 = vld [vmem:[%s1019_s30 + $0x2e8] sm:$0xff] }
  0x64   : > { %486 = vst [vmem:[%s1028_s25 + $0x2e0] sm:$0xff] %v230_v28  ;;  %v232_v30 = vld [vmem:[%s1019_s30 + $0x2f0] sm:$0xff]  ;;  %v233_v31 = vld [vmem:[%s1019_s30 + $0x2f8] sm:$0xff]  ;;  %487 = vst [vmem:[%s1028_s25 + $0x2e8] sm:$0xff] %v231_v29 }
  0x65   : > { %488 = vst [vmem:[%s1028_s25 + $0x2f0] sm:$0xff] %v232_v30  ;;  %489 = vst [vmem:[%s1028_s25 + $0x2f8] sm:$0xff] %v233_v31  ;;  %v234_v32 = vld [vmem:[%s1019_s30 + $0x300] sm:$0xff]  ;;  %v235_v33 = vld [vmem:[%s1019_s30 + $0x308] sm:$0xff] }
  0x66   : > { %v236_v34 = vld [vmem:[%s1019_s30 + $0x310] sm:$0xff]  ;;  %490 = vst [vmem:[%s1028_s25 + $0x300] sm:$0xff] %v234_v32  ;;  %491 = vst [vmem:[%s1028_s25 + $0x308] sm:$0xff] %v235_v33  ;;  %v237_v35 = vld [vmem:[%s1019_s30 + $0x318] sm:$0xff] }
  0x67   : > { %492 = vst [vmem:[%s1028_s25 + $0x310] sm:$0xff] %v236_v34  ;;  %v238_v36 = vld [vmem:[%s1019_s30 + $0x320] sm:$0xff]  ;;  %v239_v37 = vld [vmem:[%s1019_s30 + $0x328] sm:$0xff]  ;;  %493 = vst [vmem:[%s1028_s25 + $0x318] sm:$0xff] %v237_v35 }
  0x68   : > { %494 = vst [vmem:[%s1028_s25 + $0x320] sm:$0xff] %v238_v36  ;;  %495 = vst [vmem:[%s1028_s25 + $0x328] sm:$0xff] %v239_v37  ;;  %v240_v38 = vld [vmem:[%s1019_s30 + $0x330] sm:$0xff]  ;;  %v241_v39 = vld [vmem:[%s1019_s30 + $0x338] sm:$0xff] }
  0x69   : > { %v242_v40 = vld [vmem:[%s1019_s30 + $0x340] sm:$0xff]  ;;  %496 = vst [vmem:[%s1028_s25 + $0x330] sm:$0xff] %v240_v38  ;;  %497 = vst [vmem:[%s1028_s25 + $0x338] sm:$0xff] %v241_v39  ;;  %v243_v41 = vld [vmem:[%s1019_s30 + $0x348] sm:$0xff] }
  0x6a   : > { %498 = vst [vmem:[%s1028_s25 + $0x340] sm:$0xff] %v242_v40  ;;  %v244_v42 = vld [vmem:[%s1019_s30 + $0x350] sm:$0xff]  ;;  %v245_v43 = vld [vmem:[%s1019_s30 + $0x358] sm:$0xff]  ;;  %499 = vst [vmem:[%s1028_s25 + $0x348] sm:$0xff] %v243_v41 }
  0x6b   : > { %500 = vst [vmem:[%s1028_s25 + $0x350] sm:$0xff] %v244_v42  ;;  %501 = vst [vmem:[%s1028_s25 + $0x358] sm:$0xff] %v245_v43  ;;  %v246_v44 = vld [vmem:[%s1019_s30 + $0x360] sm:$0xff]  ;;  %v247_v45 = vld [vmem:[%s1019_s30 + $0x368] sm:$0xff] }
  0x6c   : > { %v248_v46 = vld [vmem:[%s1019_s30 + $0x370] sm:$0xff]  ;;  %502 = vst [vmem:[%s1028_s25 + $0x360] sm:$0xff] %v246_v44  ;;  %503 = vst [vmem:[%s1028_s25 + $0x368] sm:$0xff] %v247_v45  ;;  %v249_v47 = vld [vmem:[%s1019_s30 + $0x378] sm:$0xff] }
  0x6d   : > { %504 = vst [vmem:[%s1028_s25 + $0x370] sm:$0xff] %v248_v46  ;;  %v250_v48 = vld [vmem:[%s1019_s30 + $0x380] sm:$0xff]  ;;  %v251_v49 = vld [vmem:[%s1019_s30 + $0x388] sm:$0xff]  ;;  %505 = vst [vmem:[%s1028_s25 + $0x378] sm:$0xff] %v249_v47 }
  0x6e   : > { %506 = vst [vmem:[%s1028_s25 + $0x380] sm:$0xff] %v250_v48  ;;  %507 = vst [vmem:[%s1028_s25 + $0x388] sm:$0xff] %v251_v49  ;;  %v252_v50 = vld [vmem:[%s1019_s30 + $0x390] sm:$0xff]  ;;  %v253_v51 = vld [vmem:[%s1019_s30 + $0x398] sm:$0xff] }
  0x6f   : > { %v254_v52 = vld [vmem:[%s1019_s30 + $0x3a0] sm:$0xff]  ;;  %508 = vst [vmem:[%s1028_s25 + $0x390] sm:$0xff] %v252_v50  ;;  %509 = vst [vmem:[%s1028_s25 + $0x398] sm:$0xff] %v253_v51  ;;  %v255_v53 = vld [vmem:[%s1019_s30 + $0x3a8] sm:$0xff] }
  0x70   : > { %510 = vst [vmem:[%s1028_s25 + $0x3a0] sm:$0xff] %v254_v52  ;;  %v256_v54 = vld [vmem:[%s1019_s30 + $0x3b0] sm:$0xff]  ;;  %v257_v55 = vld [vmem:[%s1019_s30 + $0x3b8] sm:$0xff]  ;;  %511 = vst [vmem:[%s1028_s25 + $0x3a8] sm:$0xff] %v255_v53 }
  0x71   : > { %512 = vst [vmem:[%s1028_s25 + $0x3b0] sm:$0xff] %v256_v54  ;;  %513 = vst [vmem:[%s1028_s25 + $0x3b8] sm:$0xff] %v257_v55  ;;  %v258_v56 = vld [vmem:[%s1019_s30 + $0x3c0] sm:$0xff]  ;;  %v259_v57 = vld [vmem:[%s1019_s30 + $0x3c8] sm:$0xff] }
  0x72   : > { %v260_v58 = vld [vmem:[%s1019_s30 + $0x3d0] sm:$0xff]  ;;  %514 = vst [vmem:[%s1028_s25 + $0x3c0] sm:$0xff] %v258_v56  ;;  %515 = vst [vmem:[%s1028_s25 + $0x3c8] sm:$0xff] %v259_v57  ;;  %v261_v59 = vld [vmem:[%s1019_s30 + $0x3d8] sm:$0xff] }
  0x73   : > { %516 = vst [vmem:[%s1028_s25 + $0x3d0] sm:$0xff] %v260_v58  ;;  %v262_v60 = vld [vmem:[%s1019_s30 + $0x3e0] sm:$0xff]  ;;  %v263_v61 = vld [vmem:[%s1019_s30 + $0x3e8] sm:$0xff]  ;;  %517 = vst [vmem:[%s1028_s25 + $0x3d8] sm:$0xff] %v261_v59 }
  0x74   : > { %518 = vst [vmem:[%s1028_s25 + $0x3e0] sm:$0xff] %v262_v60  ;;  %519 = vst [vmem:[%s1028_s25 + $0x3e8] sm:$0xff] %v263_v61  ;;  %v264_v62 = vld [vmem:[%s1019_s30 + $0x3f0] sm:$0xff]  ;;  %v265_v63 = vld [vmem:[%s1019_s30 + $0x3f8] sm:$0xff] }
  0x75   : > { %v266_v0 = vld [vmem:[%s1019_s30 + $0x400] sm:$0xff]  ;;  %520 = vst [vmem:[%s1028_s25 + $0x3f0] sm:$0xff] %v264_v62  ;;  %521 = vst [vmem:[%s1028_s25 + $0x3f8] sm:$0xff] %v265_v63  ;;  %v267_v1 = vld [vmem:[%s1019_s30 + $0x408] sm:$0xff] }
  0x76   : > { %522 = vst [vmem:[%s1028_s25 + $0x400] sm:$0xff] %v266_v0  ;;  %v268_v2 = vld [vmem:[%s1019_s30 + $0x410] sm:$0xff]  ;;  %v269_v3 = vld [vmem:[%s1019_s30 + $0x418] sm:$0xff]  ;;  %523 = vst [vmem:[%s1028_s25 + $0x408] sm:$0xff] %v267_v1 }
  0x77   : > { %524 = vst [vmem:[%s1028_s25 + $0x410] sm:$0xff] %v268_v2  ;;  %525 = vst [vmem:[%s1028_s25 + $0x418] sm:$0xff] %v269_v3  ;;  %v270_v4 = vld [vmem:[%s1019_s30 + $0x420] sm:$0xff]  ;;  %v271_v5 = vld [vmem:[%s1019_s30 + $0x428] sm:$0xff] }
  0x78   : > { %v272_v6 = vld [vmem:[%s1019_s30 + $0x430] sm:$0xff]  ;;  %526 = vst [vmem:[%s1028_s25 + $0x420] sm:$0xff] %v270_v4  ;;  %527 = vst [vmem:[%s1028_s25 + $0x428] sm:$0xff] %v271_v5  ;;  %v273_v7 = vld [vmem:[%s1019_s30 + $0x438] sm:$0xff] }
  0x79   : > { %528 = vst [vmem:[%s1028_s25 + $0x430] sm:$0xff] %v272_v6  ;;  %v274_v8 = vld [vmem:[%s1019_s30 + $0x440] sm:$0xff]  ;;  %v275_v9 = vld [vmem:[%s1019_s30 + $0x448] sm:$0xff]  ;;  %529 = vst [vmem:[%s1028_s25 + $0x438] sm:$0xff] %v273_v7 }
  0x7a   : > { %530 = vst [vmem:[%s1028_s25 + $0x440] sm:$0xff] %v274_v8  ;;  %531 = vst [vmem:[%s1028_s25 + $0x448] sm:$0xff] %v275_v9  ;;  %v276_v10 = vld [vmem:[%s1019_s30 + $0x450] sm:$0xff]  ;;  %v277_v11 = vld [vmem:[%s1019_s30 + $0x458] sm:$0xff] }
  0x7b   : > { %v278_v12 = vld [vmem:[%s1019_s30 + $0x460] sm:$0xff]  ;;  %532 = vst [vmem:[%s1028_s25 + $0x450] sm:$0xff] %v276_v10  ;;  %533 = vst [vmem:[%s1028_s25 + $0x458] sm:$0xff] %v277_v11  ;;  %v279_v13 = vld [vmem:[%s1019_s30 + $0x468] sm:$0xff] }
  0x7c   : > { %534 = vst [vmem:[%s1028_s25 + $0x460] sm:$0xff] %v278_v12  ;;  %v280_v14 = vld [vmem:[%s1019_s30 + $0x470] sm:$0xff]  ;;  %v281_v15 = vld [vmem:[%s1019_s30 + $0x478] sm:$0xff]  ;;  %535 = vst [vmem:[%s1028_s25 + $0x468] sm:$0xff] %v279_v13 }
  0x7d   : > { %536 = vst [vmem:[%s1028_s25 + $0x470] sm:$0xff] %v280_v14  ;;  %537 = vst [vmem:[%s1028_s25 + $0x478] sm:$0xff] %v281_v15  ;;  %v282_v16 = vld [vmem:[%s1019_s30 + $0x480] sm:$0xff]  ;;  %v283_v17 = vld [vmem:[%s1019_s30 + $0x488] sm:$0xff] }
  0x7e   : > { %v284_v18 = vld [vmem:[%s1019_s30 + $0x490] sm:$0xff]  ;;  %538 = vst [vmem:[%s1028_s25 + $0x480] sm:$0xff] %v282_v16  ;;  %539 = vst [vmem:[%s1028_s25 + $0x488] sm:$0xff] %v283_v17  ;;  %v285_v19 = vld [vmem:[%s1019_s30 + $0x498] sm:$0xff] }
  0x7f   : > { %540 = vst [vmem:[%s1028_s25 + $0x490] sm:$0xff] %v284_v18  ;;  %v286_v20 = vld [vmem:[%s1019_s30 + $0x4a0] sm:$0xff]  ;;  %v287_v21 = vld [vmem:[%s1019_s30 + $0x4a8] sm:$0xff]  ;;  %541 = vst [vmem:[%s1028_s25 + $0x498] sm:$0xff] %v285_v19 }
  0x80   : > { %542 = vst [vmem:[%s1028_s25 + $0x4a0] sm:$0xff] %v286_v20  ;;  %543 = vst [vmem:[%s1028_s25 + $0x4a8] sm:$0xff] %v287_v21  ;;  %v288_v22 = vld [vmem:[%s1019_s30 + $0x4b0] sm:$0xff]  ;;  %v289_v23 = vld [vmem:[%s1019_s30 + $0x4b8] sm:$0xff] }
  0x81   : > { %v290_v24 = vld [vmem:[%s1019_s30 + $0x4c0] sm:$0xff]  ;;  %544 = vst [vmem:[%s1028_s25 + $0x4b0] sm:$0xff] %v288_v22  ;;  %545 = vst [vmem:[%s1028_s25 + $0x4b8] sm:$0xff] %v289_v23  ;;  %v291_v25 = vld [vmem:[%s1019_s30 + $0x4c8] sm:$0xff] }
  0x82   : > { %546 = vst [vmem:[%s1028_s25 + $0x4c0] sm:$0xff] %v290_v24  ;;  %v292_v26 = vld [vmem:[%s1019_s30 + $0x4d0] sm:$0xff]  ;;  %v293_v27 = vld [vmem:[%s1019_s30 + $0x4d8] sm:$0xff]  ;;  %547 = vst [vmem:[%s1028_s25 + $0x4c8] sm:$0xff] %v291_v25 }
  0x83   : > { %548 = vst [vmem:[%s1028_s25 + $0x4d0] sm:$0xff] %v292_v26  ;;  %549 = vst [vmem:[%s1028_s25 + $0x4d8] sm:$0xff] %v293_v27  ;;  %v294_v28 = vld [vmem:[%s1019_s30 + $0x4e0] sm:$0xff]  ;;  %v295_v29 = vld [vmem:[%s1019_s30 + $0x4e8] sm:$0xff] }
  0x84   : > { %v296_v30 = vld [vmem:[%s1019_s30 + $0x4f0] sm:$0xff]  ;;  %550 = vst [vmem:[%s1028_s25 + $0x4e0] sm:$0xff] %v294_v28  ;;  %551 = vst [vmem:[%s1028_s25 + $0x4e8] sm:$0xff] %v295_v29  ;;  %v297_v31 = vld [vmem:[%s1019_s30 + $0x4f8] sm:$0xff] }
  0x85   : > { %552 = vst [vmem:[%s1028_s25 + $0x4f0] sm:$0xff] %v296_v30  ;;  %v298_v32 = vld [vmem:[%s1019_s30 + $0x500] sm:$0xff]  ;;  %v299_v33 = vld [vmem:[%s1019_s30 + $0x508] sm:$0xff]  ;;  %553 = vst [vmem:[%s1028_s25 + $0x4f8] sm:$0xff] %v297_v31 }
  0x86   : > { %554 = vst [vmem:[%s1028_s25 + $0x500] sm:$0xff] %v298_v32  ;;  %555 = vst [vmem:[%s1028_s25 + $0x508] sm:$0xff] %v299_v33  ;;  %v300_v34 = vld [vmem:[%s1019_s30 + $0x510] sm:$0xff]  ;;  %v301_v35 = vld [vmem:[%s1019_s30 + $0x518] sm:$0xff] }
  0x87   : > { %v302_v36 = vld [vmem:[%s1019_s30 + $0x520] sm:$0xff]  ;;  %556 = vst [vmem:[%s1028_s25 + $0x510] sm:$0xff] %v300_v34  ;;  %557 = vst [vmem:[%s1028_s25 + $0x518] sm:$0xff] %v301_v35  ;;  %v303_v37 = vld [vmem:[%s1019_s30 + $0x528] sm:$0xff] }
  0x88   : > { %558 = vst [vmem:[%s1028_s25 + $0x520] sm:$0xff] %v302_v36  ;;  %v304_v38 = vld [vmem:[%s1019_s30 + $0x530] sm:$0xff]  ;;  %v305_v39 = vld [vmem:[%s1019_s30 + $0x538] sm:$0xff]  ;;  %559 = vst [vmem:[%s1028_s25 + $0x528] sm:$0xff] %v303_v37 }
  0x89   : > { %560 = vst [vmem:[%s1028_s25 + $0x530] sm:$0xff] %v304_v38  ;;  %561 = vst [vmem:[%s1028_s25 + $0x538] sm:$0xff] %v305_v39  ;;  %v306_v40 = vld [vmem:[%s1019_s30 + $0x540] sm:$0xff]  ;;  %v307_v41 = vld [vmem:[%s1019_s30 + $0x548] sm:$0xff] }
  0x8a   : > { %v308_v42 = vld [vmem:[%s1019_s30 + $0x550] sm:$0xff]  ;;  %562 = vst [vmem:[%s1028_s25 + $0x540] sm:$0xff] %v306_v40  ;;  %563 = vst [vmem:[%s1028_s25 + $0x548] sm:$0xff] %v307_v41  ;;  %v309_v43 = vld [vmem:[%s1019_s30 + $0x558] sm:$0xff] }
  0x8b   : > { %564 = vst [vmem:[%s1028_s25 + $0x550] sm:$0xff] %v308_v42  ;;  %v310_v44 = vld [vmem:[%s1019_s30 + $0x560] sm:$0xff]  ;;  %v311_v45 = vld [vmem:[%s1019_s30 + $0x568] sm:$0xff]  ;;  %565 = vst [vmem:[%s1028_s25 + $0x558] sm:$0xff] %v309_v43 }
  0x8c   : > { %566 = vst [vmem:[%s1028_s25 + $0x560] sm:$0xff] %v310_v44  ;;  %567 = vst [vmem:[%s1028_s25 + $0x568] sm:$0xff] %v311_v45  ;;  %v312_v46 = vld [vmem:[%s1019_s30 + $0x570] sm:$0xff]  ;;  %v313_v47 = vld [vmem:[%s1019_s30 + $0x578] sm:$0xff] }
  0x8d   : > { %v314_v48 = vld [vmem:[%s1019_s30 + $0x580] sm:$0xff]  ;;  %568 = vst [vmem:[%s1028_s25 + $0x570] sm:$0xff] %v312_v46  ;;  %569 = vst [vmem:[%s1028_s25 + $0x578] sm:$0xff] %v313_v47  ;;  %v315_v49 = vld [vmem:[%s1019_s30 + $0x588] sm:$0xff] }
  0x8e   : > { %570 = vst [vmem:[%s1028_s25 + $0x580] sm:$0xff] %v314_v48  ;;  %v316_v50 = vld [vmem:[%s1019_s30 + $0x590] sm:$0xff]  ;;  %v317_v51 = vld [vmem:[%s1019_s30 + $0x598] sm:$0xff]  ;;  %571 = vst [vmem:[%s1028_s25 + $0x588] sm:$0xff] %v315_v49 }
  0x8f   : > { %572 = vst [vmem:[%s1028_s25 + $0x590] sm:$0xff] %v316_v50  ;;  %573 = vst [vmem:[%s1028_s25 + $0x598] sm:$0xff] %v317_v51  ;;  %v318_v52 = vld [vmem:[%s1019_s30 + $0x5a0] sm:$0xff]  ;;  %v319_v53 = vld [vmem:[%s1019_s30 + $0x5a8] sm:$0xff] }
  0x90   : > { %v320_v54 = vld [vmem:[%s1019_s30 + $0x5b0] sm:$0xff]  ;;  %574 = vst [vmem:[%s1028_s25 + $0x5a0] sm:$0xff] %v318_v52  ;;  %575 = vst [vmem:[%s1028_s25 + $0x5a8] sm:$0xff] %v319_v53  ;;  %v321_v55 = vld [vmem:[%s1019_s30 + $0x5b8] sm:$0xff] }
  0x91   : > { %576 = vst [vmem:[%s1028_s25 + $0x5b0] sm:$0xff] %v320_v54  ;;  %v322_v56 = vld [vmem:[%s1019_s30 + $0x5c0] sm:$0xff]  ;;  %v323_v57 = vld [vmem:[%s1019_s30 + $0x5c8] sm:$0xff]  ;;  %577 = vst [vmem:[%s1028_s25 + $0x5b8] sm:$0xff] %v321_v55 }
  0x92   : > { %578 = vst [vmem:[%s1028_s25 + $0x5c0] sm:$0xff] %v322_v56  ;;  %579 = vst [vmem:[%s1028_s25 + $0x5c8] sm:$0xff] %v323_v57  ;;  %v324_v58 = vld [vmem:[%s1019_s30 + $0x5d0] sm:$0xff]  ;;  %v325_v59 = vld [vmem:[%s1019_s30 + $0x5d8] sm:$0xff] }
  0x93   : > { %v326_v60 = vld [vmem:[%s1019_s30 + $0x5e0] sm:$0xff]  ;;  %580 = vst [vmem:[%s1028_s25 + $0x5d0] sm:$0xff] %v324_v58  ;;  %581 = vst [vmem:[%s1028_s25 + $0x5d8] sm:$0xff] %v325_v59  ;;  %v327_v61 = vld [vmem:[%s1019_s30 + $0x5e8] sm:$0xff] }
  0x94   : > { %582 = vst [vmem:[%s1028_s25 + $0x5e0] sm:$0xff] %v326_v60  ;;  %v328_v62 = vld [vmem:[%s1019_s30 + $0x5f0] sm:$0xff]  ;;  %v329_v63 = vld [vmem:[%s1019_s30 + $0x5f8] sm:$0xff]  ;;  %583 = vst [vmem:[%s1028_s25 + $0x5e8] sm:$0xff] %v327_v61 }
  0x95   : > { %584 = vst [vmem:[%s1028_s25 + $0x5f0] sm:$0xff] %v328_v62  ;;  %585 = vst [vmem:[%s1028_s25 + $0x5f8] sm:$0xff] %v329_v63  ;;  %v330_v0 = vld [vmem:[%s1019_s30 + $0x600] sm:$0xff]  ;;  %v331_v1 = vld [vmem:[%s1019_s30 + $0x608] sm:$0xff] }
  0x96   : > { %v332_v2 = vld [vmem:[%s1019_s30 + $0x610] sm:$0xff]  ;;  %586 = vst [vmem:[%s1028_s25 + $0x600] sm:$0xff] %v330_v0  ;;  %587 = vst [vmem:[%s1028_s25 + $0x608] sm:$0xff] %v331_v1  ;;  %v333_v3 = vld [vmem:[%s1019_s30 + $0x618] sm:$0xff] }
  0x97   : > { %588 = vst [vmem:[%s1028_s25 + $0x610] sm:$0xff] %v332_v2  ;;  %v334_v4 = vld [vmem:[%s1019_s30 + $0x620] sm:$0xff]  ;;  %v335_v5 = vld [vmem:[%s1019_s30 + $0x628] sm:$0xff]  ;;  %589 = vst [vmem:[%s1028_s25 + $0x618] sm:$0xff] %v333_v3 }
  0x98   : > { %590 = vst [vmem:[%s1028_s25 + $0x620] sm:$0xff] %v334_v4  ;;  %591 = vst [vmem:[%s1028_s25 + $0x628] sm:$0xff] %v335_v5  ;;  %v336_v6 = vld [vmem:[%s1019_s30 + $0x630] sm:$0xff]  ;;  %v337_v7 = vld [vmem:[%s1019_s30 + $0x638] sm:$0xff] }
  0x99   : > { %v338_v8 = vld [vmem:[%s1019_s30 + $0x640] sm:$0xff]  ;;  %592 = vst [vmem:[%s1028_s25 + $0x630] sm:$0xff] %v336_v6  ;;  %593 = vst [vmem:[%s1028_s25 + $0x638] sm:$0xff] %v337_v7  ;;  %v339_v9 = vld [vmem:[%s1019_s30 + $0x648] sm:$0xff] }
  0x9a   : > { %594 = vst [vmem:[%s1028_s25 + $0x640] sm:$0xff] %v338_v8  ;;  %v340_v10 = vld [vmem:[%s1019_s30 + $0x650] sm:$0xff]  ;;  %v341_v11 = vld [vmem:[%s1019_s30 + $0x658] sm:$0xff]  ;;  %595 = vst [vmem:[%s1028_s25 + $0x648] sm:$0xff] %v339_v9 }
  0x9b   : > { %596 = vst [vmem:[%s1028_s25 + $0x650] sm:$0xff] %v340_v10  ;;  %597 = vst [vmem:[%s1028_s25 + $0x658] sm:$0xff] %v341_v11  ;;  %v342_v12 = vld [vmem:[%s1019_s30 + $0x660] sm:$0xff]  ;;  %v343_v13 = vld [vmem:[%s1019_s30 + $0x668] sm:$0xff] }
  0x9c   : > { %v344_v14 = vld [vmem:[%s1019_s30 + $0x670] sm:$0xff]  ;;  %598 = vst [vmem:[%s1028_s25 + $0x660] sm:$0xff] %v342_v12  ;;  %599 = vst [vmem:[%s1028_s25 + $0x668] sm:$0xff] %v343_v13  ;;  %v345_v15 = vld [vmem:[%s1019_s30 + $0x678] sm:$0xff] }
  0x9d   : > { %600 = vst [vmem:[%s1028_s25 + $0x670] sm:$0xff] %v344_v14  ;;  %v346_v16 = vld [vmem:[%s1019_s30 + $0x680] sm:$0xff]  ;;  %v347_v17 = vld [vmem:[%s1019_s30 + $0x688] sm:$0xff]  ;;  %601 = vst [vmem:[%s1028_s25 + $0x678] sm:$0xff] %v345_v15 }
  0x9e   : > { %602 = vst [vmem:[%s1028_s25 + $0x680] sm:$0xff] %v346_v16  ;;  %603 = vst [vmem:[%s1028_s25 + $0x688] sm:$0xff] %v347_v17  ;;  %v348_v18 = vld [vmem:[%s1019_s30 + $0x690] sm:$0xff]  ;;  %v349_v19 = vld [vmem:[%s1019_s30 + $0x698] sm:$0xff] }
  0x9f   : > { %v350_v20 = vld [vmem:[%s1019_s30 + $0x6a0] sm:$0xff]  ;;  %604 = vst [vmem:[%s1028_s25 + $0x690] sm:$0xff] %v348_v18  ;;  %605 = vst [vmem:[%s1028_s25 + $0x698] sm:$0xff] %v349_v19  ;;  %v351_v21 = vld [vmem:[%s1019_s30 + $0x6a8] sm:$0xff] }
  0xa0   : > { %606 = vst [vmem:[%s1028_s25 + $0x6a0] sm:$0xff] %v350_v20  ;;  %v352_v22 = vld [vmem:[%s1019_s30 + $0x6b0] sm:$0xff]  ;;  %v353_v23 = vld [vmem:[%s1019_s30 + $0x6b8] sm:$0xff]  ;;  %607 = vst [vmem:[%s1028_s25 + $0x6a8] sm:$0xff] %v351_v21 }
  0xa1   : > { %608 = vst [vmem:[%s1028_s25 + $0x6b0] sm:$0xff] %v352_v22  ;;  %609 = vst [vmem:[%s1028_s25 + $0x6b8] sm:$0xff] %v353_v23  ;;  %v354_v24 = vld [vmem:[%s1019_s30 + $0x6c0] sm:$0xff]  ;;  %v355_v25 = vld [vmem:[%s1019_s30 + $0x6c8] sm:$0xff] }
  0xa2   : > { %v356_v26 = vld [vmem:[%s1019_s30 + $0x6d0] sm:$0xff]  ;;  %610 = vst [vmem:[%s1028_s25 + $0x6c0] sm:$0xff] %v354_v24  ;;  %611 = vst [vmem:[%s1028_s25 + $0x6c8] sm:$0xff] %v355_v25  ;;  %v357_v27 = vld [vmem:[%s1019_s30 + $0x6d8] sm:$0xff] }
  0xa3   : > { %612 = vst [vmem:[%s1028_s25 + $0x6d0] sm:$0xff] %v356_v26  ;;  %v358_v28 = vld [vmem:[%s1019_s30 + $0x6e0] sm:$0xff]  ;;  %v359_v29 = vld [vmem:[%s1019_s30 + $0x6e8] sm:$0xff]  ;;  %613 = vst [vmem:[%s1028_s25 + $0x6d8] sm:$0xff] %v357_v27 }
  0xa4   : > { %614 = vst [vmem:[%s1028_s25 + $0x6e0] sm:$0xff] %v358_v28  ;;  %615 = vst [vmem:[%s1028_s25 + $0x6e8] sm:$0xff] %v359_v29  ;;  %v360_v30 = vld [vmem:[%s1019_s30 + $0x6f0] sm:$0xff]  ;;  %v361_v31 = vld [vmem:[%s1019_s30 + $0x6f8] sm:$0xff] }
  0xa5   : > { %v362_v32 = vld [vmem:[%s1019_s30 + $0x700] sm:$0xff]  ;;  %616 = vst [vmem:[%s1028_s25 + $0x6f0] sm:$0xff] %v360_v30  ;;  %617 = vst [vmem:[%s1028_s25 + $0x6f8] sm:$0xff] %v361_v31  ;;  %v363_v33 = vld [vmem:[%s1019_s30 + $0x708] sm:$0xff] }
  0xa6   : > { %618 = vst [vmem:[%s1028_s25 + $0x700] sm:$0xff] %v362_v32  ;;  %v364_v34 = vld [vmem:[%s1019_s30 + $0x710] sm:$0xff]  ;;  %v365_v35 = vld [vmem:[%s1019_s30 + $0x718] sm:$0xff]  ;;  %619 = vst [vmem:[%s1028_s25 + $0x708] sm:$0xff] %v363_v33 }
  0xa7   : > { %620 = vst [vmem:[%s1028_s25 + $0x710] sm:$0xff] %v364_v34  ;;  %621 = vst [vmem:[%s1028_s25 + $0x718] sm:$0xff] %v365_v35  ;;  %v366_v36 = vld [vmem:[%s1019_s30 + $0x720] sm:$0xff]  ;;  %v367_v37 = vld [vmem:[%s1019_s30 + $0x728] sm:$0xff] }
  0xa8   : > { %v368_v38 = vld [vmem:[%s1019_s30 + $0x730] sm:$0xff]  ;;  %622 = vst [vmem:[%s1028_s25 + $0x720] sm:$0xff] %v366_v36  ;;  %623 = vst [vmem:[%s1028_s25 + $0x728] sm:$0xff] %v367_v37  ;;  %v369_v39 = vld [vmem:[%s1019_s30 + $0x738] sm:$0xff] }
  0xa9   : > { %624 = vst [vmem:[%s1028_s25 + $0x730] sm:$0xff] %v368_v38  ;;  %v370_v40 = vld [vmem:[%s1019_s30 + $0x740] sm:$0xff]  ;;  %v371_v41 = vld [vmem:[%s1019_s30 + $0x748] sm:$0xff]  ;;  %625 = vst [vmem:[%s1028_s25 + $0x738] sm:$0xff] %v369_v39 }
  0xaa   : > { %626 = vst [vmem:[%s1028_s25 + $0x740] sm:$0xff] %v370_v40  ;;  %627 = vst [vmem:[%s1028_s25 + $0x748] sm:$0xff] %v371_v41  ;;  %v372_v42 = vld [vmem:[%s1019_s30 + $0x750] sm:$0xff]  ;;  %v373_v43 = vld [vmem:[%s1019_s30 + $0x758] sm:$0xff] }
  0xab   : > { %v374_v44 = vld [vmem:[%s1019_s30 + $0x760] sm:$0xff]  ;;  %628 = vst [vmem:[%s1028_s25 + $0x750] sm:$0xff] %v372_v42  ;;  %629 = vst [vmem:[%s1028_s25 + $0x758] sm:$0xff] %v373_v43  ;;  %v375_v45 = vld [vmem:[%s1019_s30 + $0x768] sm:$0xff] }
  0xac   : > { %630 = vst [vmem:[%s1028_s25 + $0x760] sm:$0xff] %v374_v44  ;;  %v376_v46 = vld [vmem:[%s1019_s30 + $0x770] sm:$0xff]  ;;  %v377_v47 = vld [vmem:[%s1019_s30 + $0x778] sm:$0xff]  ;;  %631 = vst [vmem:[%s1028_s25 + $0x768] sm:$0xff] %v375_v45 }
  0xad   : > { %632 = vst [vmem:[%s1028_s25 + $0x770] sm:$0xff] %v376_v46  ;;  %633 = vst [vmem:[%s1028_s25 + $0x778] sm:$0xff] %v377_v47  ;;  %v378_v48 = vld [vmem:[%s1019_s30 + $0x780] sm:$0xff]  ;;  %v379_v49 = vld [vmem:[%s1019_s30 + $0x788] sm:$0xff] }
  0xae   : > { %v380_v50 = vld [vmem:[%s1019_s30 + $0x790] sm:$0xff]  ;;  %634 = vst [vmem:[%s1028_s25 + $0x780] sm:$0xff] %v378_v48  ;;  %635 = vst [vmem:[%s1028_s25 + $0x788] sm:$0xff] %v379_v49  ;;  %v381_v51 = vld [vmem:[%s1019_s30 + $0x798] sm:$0xff] }
  0xaf   : > { %636 = vst [vmem:[%s1028_s25 + $0x790] sm:$0xff] %v380_v50  ;;  %v382_v52 = vld [vmem:[%s1019_s30 + $0x7a0] sm:$0xff]  ;;  %v383_v53 = vld [vmem:[%s1019_s30 + $0x7a8] sm:$0xff]  ;;  %637 = vst [vmem:[%s1028_s25 + $0x798] sm:$0xff] %v381_v51 }
  0xb0   : > { %638 = vst [vmem:[%s1028_s25 + $0x7a0] sm:$0xff] %v382_v52  ;;  %639 = vst [vmem:[%s1028_s25 + $0x7a8] sm:$0xff] %v383_v53  ;;  %v384_v54 = vld [vmem:[%s1019_s30 + $0x7b0] sm:$0xff]  ;;  %v385_v55 = vld [vmem:[%s1019_s30 + $0x7b8] sm:$0xff] }
  0xb1   : > { %v386_v56 = vld [vmem:[%s1019_s30 + $0x7c0] sm:$0xff]  ;;  %640 = vst [vmem:[%s1028_s25 + $0x7b0] sm:$0xff] %v384_v54  ;;  %641 = vst [vmem:[%s1028_s25 + $0x7b8] sm:$0xff] %v385_v55  ;;  %v387_v57 = vld [vmem:[%s1019_s30 + $0x7c8] sm:$0xff] }
  0xb2   : > { %642 = vst [vmem:[%s1028_s25 + $0x7c0] sm:$0xff] %v386_v56  ;;  %v388_v58 = vld [vmem:[%s1019_s30 + $0x7d0] sm:$0xff]  ;;  %v389_v59 = vld [vmem:[%s1019_s30 + $0x7d8] sm:$0xff]  ;;  %643 = vst [vmem:[%s1028_s25 + $0x7c8] sm:$0xff] %v387_v57 }
  0xb3   : > { %644 = vst [vmem:[%s1028_s25 + $0x7d0] sm:$0xff] %v388_v58  ;;  %645 = vst [vmem:[%s1028_s25 + $0x7d8] sm:$0xff] %v389_v59  ;;  %v390_v60 = vld [vmem:[%s1019_s30 + $0x7e0] sm:$0xff]  ;;  %v391_v61 = vld [vmem:[%s1019_s30 + $0x7e8] sm:$0xff] }
  0xb4   : > { %v392_v62 = vld [vmem:[%s1019_s30 + $0x7f0] sm:$0xff]  ;;  %646 = vst [vmem:[%s1028_s25 + $0x7e0] sm:$0xff] %v390_v60  ;;  %647 = vst [vmem:[%s1028_s25 + $0x7e8] sm:$0xff] %v391_v61  ;;  %v393_v63 = vld [vmem:[%s1019_s30 + $0x7f8] sm:$0xff] }
  0xb5   : > { %648 = vst [vmem:[%s1028_s25 + $0x7f0] sm:$0xff] %v392_v62  ;;  %649 = vst [vmem:[%s1028_s25 + $0x7f8] sm:$0xff] %v393_v63 }
  0xb6   : > { %849 = shalt.err (!%p846_p10)
}
  0xb7   : > { %s850_s13 = scalar_lea.hbm %s1533_s29, 32768  ;;  %s854_s20 = scalar_lea.hbm %s1590_s1, 65536 }
  0xb8   : > { %p851_p0 = scmp.ne.s32.totalorder %s1533_s29, %s850_s13  ;;  %p855_p1 = scmp.lt.s32.totalorder %s1533_s29, %s1590_s1 }
  0xb9   : > { %p856_p3 = scmp.lt.s32.totalorder %s854_s20, %s850_s13 }
  0xba   : > { %p852_p2 = pnand %p851_p0, %p1599_p12 }
  0xbb   : > { %p857_p6 = por %p856_p3, %p855_p1 }
  0xbc   : > { %p853_p9 = pneg %p852_p2 }
  0xbe   : > { %p858_p11 = pnand %p857_p6, %p853_p9 }
  0xc0   : > { %861 = shalt.err (!%p858_p11)
}
  0xc1   : > { %s906_s24 = smov 1024   ;;  %s907_s26 = smov 64  }
  0xc2   : > { %760 = dma.vmem_to_hbm [thread:$0]  (%p1599_p12), %s1535_s27, 32768, %s1533_s29, %s651_s2, %s906_s24, %s906_s24, %s907_s26  }
  0xc3 PF: > { %s680_s30 = sand.u32 1, %s888_s6   ;;  %p1600_p13 = scmp.ne.s32.totalorder %s1596_s19, 0 }
  0xc4   : > { %p1601_p4 = scmp.ge.s32.totalorder %s900_s9, 2  ;;  %s681_s25 = scalar_lea.sflag [#allocation4], %s680_s30 }
  0xc6   : > { %p767_p5 = pnand %p1601_p4, %p1600_p13 }
  0xc8   : > { %p768_p7 = pneg %p767_p5 }
  0xca   : > { %883 = dma.done.wait (%p768_p7), %s681_s25, 32768  }
  0xcb   : > { %885 = vsyncadd (%p768_p7), %s681_s25, 4294934528  ;;  %p14_p8 = scmp.ge.s32.totalorder %s943_s12, 4   ;;  %s1602_s6 = smov %s892_s7 }
  0xcc   : > { %s1603_s7 = smov %s896_s8  ;;  %s1604_s8 = smov %s955_s15 }
  0xcd   : > { %s1605_s9 = smov %s943_s12  ;;  %16 = sbr.rel (!%p14_p8) target bundleno = 5 (0x5), region = 69 }
  0xd2   :  { %686 = vsyncpa [#allocation3], 1 }
  0xd3   :  { %688 = vsyncpa [#allocation3 + $0x1], 1 }
  0xd4   :  { %689 = vsyncpa [#allocation4], 1 }
  0xd5   :  { %691 = vsyncpa [#allocation4 + $0x1], 1 }

</bundles_post_ra>
